<compile_context>
chip_gen: v7x
topology: tpu7x:2x2x1
jax: 0.10.0
libtpu: 0.0.40
codegen_flags: <defaults>
</compile_context>

<pallas_src>
import jax
import jax.numpy as jnp
from jax import lax
from jax.experimental import pallas as pl
from jax.experimental.pallas import tpu as pltpu


def _round_up(n: int, m: int) -> int:
    return ((n + m - 1) // m) * m


def encoder_kernel(x_ref, wih_ref, whh_ref, wfc_ref, bih_ref, bfc_ref, out_ref):
    """Fused input-projection + tanh-RNN recurrence + final Linear.

    x_ref  : (T, Bp, I)  bf16  time-major, batch-padded input
    wih_ref: (I,  Hp)    bf16  W_ih^T, zero-padded to Hp lanes
    whh_ref: (Hp, Hp)    bf16  W_hh^T, zero-padded
    wfc_ref: (Hp, Cp)    bf16  W_fc^T, zero-padded
    bih_ref: (1,  Hp)    f32   b_ih + b_hh, zero-padded
    bfc_ref: (1,  Cp)    f32   b_fc, zero-padded
    out_ref: (Bp, Cp)    f32   fc(h_T)
    """
    T, Bp, _ = x_ref.shape
    Hp = whh_ref.shape[0]

    # Loop-invariant weights / bias: load (and broadcast) once, outside the
    # time loop (JAX does not CSE broadcast_in_dim inside the unrolled loop).
    wih = wih_ref[...]
    whh = whh_ref[...]
    bias = jnp.broadcast_to(bih_ref[...], (Bp, Hp))

    def step(t, h):
        # Input projection: depends only on x -> off the serial critical path,
        # overlapped with the h-chain by the scheduler after full unroll.
        px = jnp.dot(x_ref[t], wih, preferred_element_type=jnp.float32) + bias
        # Recurrent matmul: bf16 MXU operands, f32 accumulate, f32 tanh (EUP).
        pre = px + jnp.dot(h.astype(jnp.bfloat16), whh,
                           preferred_element_type=jnp.float32)
        return jnp.tanh(pre)

    h_last = lax.fori_loop(0, T, step, jnp.zeros((Bp, Hp), jnp.float32),
                           unroll=True)

    # ys[:, -1, :] @ W_fc^T + b_fc   -- full-lane (Bp, Cp) unmasked store.
    out_ref[...] = (jnp.dot(h_last.astype(jnp.bfloat16), wfc_ref[...],
                            preferred_element_type=jnp.float32)
                    + bfc_ref[...]).astype(out_ref.dtype)


def encoder_forward(prbt, params):
    """prbt: (B, T, I) batch-first piano-roll tensor (PyTorch layout)."""
    B, T, I = prbt.shape
    w_ih, w_hh, b_ih, b_hh, w_fc, b_fc = (params[k] for k in
                                          ("w_ih", "w_hh", "b_ih", "b_hh",
                                           "w_fc", "b_fc"))
    H = w_hh.shape[0]
    C = w_fc.shape[0]

    Bp = _round_up(B, 8)      # sublane multiple
    Hp = _round_up(H, 128)    # full-lane hidden width
    Cp = _round_up(C, 128)    # full-lane output width -> unmasked store

    # Time-major, bf16, batch-padded input (one small fused relayout; the
    # projection itself now lives inside the kernel).
    x = jnp.transpose(prbt, (1, 0, 2)).astype(jnp.bfloat16)        # (T, B, I)
    if Bp != B:
        x = jnp.pad(x, ((0, 0), (0, Bp - B), (0, 0)))              # (T, Bp, I)

    # Zero-padded, pre-transposed weights (pad lanes contribute exact zeros,
    # so padded lanes of h stay 0 through the whole recurrence).
    wih_t = jnp.pad(w_ih.T.astype(jnp.bfloat16), ((0, 0), (0, Hp - H)))
    whh_t = jnp.pad(w_hh.T.astype(jnp.bfloat16), ((0, Hp - H), (0, Hp - H)))
    wfc_t = jnp.pad(w_fc.T.astype(jnp.bfloat16), ((0, Hp - H), (0, Cp - C)))
    bih = jnp.pad((b_ih + b_hh).astype(jnp.float32), (0, Hp - H)).reshape(1, Hp)
    bfc = jnp.pad(b_fc.astype(jnp.float32), (0, Cp - C)).reshape(1, Cp)

    # Single gridless invocation: everything VMEM-resident, no per-step grid
    # overhead, no double-buffering of the invariant weights.
    out_padded = pl.pallas_call(
        encoder_kernel,
        out_shape=jax.ShapeDtypeStruct((Bp, Cp), jnp.float32),
        in_specs=[
            pl.BlockSpec(memory_space=pltpu.MemorySpace.VMEM),   # x
            pl.BlockSpec(memory_space=pltpu.MemorySpace.VMEM),   # W_ih^T
            pl.BlockSpec(memory_space=pltpu.MemorySpace.VMEM),   # W_hh^T
            pl.BlockSpec(memory_space=pltpu.MemorySpace.VMEM),   # W_fc^T
            pl.BlockSpec(memory_space=pltpu.MemorySpace.VMEM),   # b_ih + b_hh
            pl.BlockSpec(memory_space=pltpu.MemorySpace.VMEM),   # b_fc
        ],
        out_specs=pl.BlockSpec(memory_space=pltpu.MemorySpace.VMEM),
    )(x, wih_t, whh_t, wfc_t, bih, bfc)

    return out_padded[:B, :C]


def encoder_reference(prbt, params):
    """Pure-JAX f32 reference matching PyTorch nn.RNN(tanh) + nn.Linear."""
    w_ih, w_hh, b_ih, b_hh, w_fc, b_fc = (params[k] for k in
                                          ("w_ih", "w_hh", "b_ih", "b_hh",
                                           "w_fc", "b_fc"))
    B = prbt.shape[0]
    H = w_hh.shape[0]

    def step(h, x_t):
        h_new = jnp.tanh(x_t @ w_ih.T + b_ih + h @ w_hh.T + b_hh)
        return h_new, None

    h0 = jnp.zeros((B, H), jnp.float32)
    x_tm = jnp.transpose(prbt, (1, 0, 2)).astype(jnp.float32)
    h_last, _ = jax.lax.scan(step, h0, x_tm)
    return h_last @ w_fc.T + b_fc


if __name__ == "__main__":
    # Shapes implied by the module's hyperparameters:
    #   input_size  = data_note_high - data_note_low + 1 = 16
    #   hidden_size = cmp_enc_rnn_hidden_size            = 32
    #   out_size    = cmp_hidden_size                    = 16
    #   num_layers=1, unidirectional, tanh RNN, batch_first=True
    B, T, I, H, C = 2, 8, 16, 32, 16

    key = jax.random.PRNGKey(0)
    kx, k1, k2, k3, k4, k5, k6 = jax.random.split(key, 7)

    prbt = (jax.random.uniform(kx, (B, T, I)) > 0.7).astype(jnp.float32)

    scale = 0.1
    params = {
        "w_ih": scale * jax.random.normal(k1, (H, I), jnp.float32),
        "w_hh": scale * jax.random.normal(k2, (H, H), jnp.float32),
        "b_ih": scale * jax.random.normal(k3, (H,), jnp.float32),
        "b_hh": scale * jax.random.normal(k4, (H,), jnp.float32),
        "w_fc": scale * jax.random.normal(k5, (C, H), jnp.float32),
        "b_fc": scale * jax.random.normal(k6, (C,), jnp.float32),
    }

    fwd = jax.jit(encoder_forward)
    out = jax.block_until_ready(fwd(prbt, params))

    ref = encoder_reference(prbt, params)
    assert out.shape == (B, C)
    # Tolerance accounts for bf16 MXU operands (f32 accumulation / f32 tanh).
    assert jnp.allclose(out, ref, atol=2e-2, rtol=2e-2), (out, ref)

    print("KERNEL_OK")
</pallas_src>

<mosaic_0001>
module attributes {stable_mosaic.version = 11 : i64} {
  func.func @encoder_kernel(%arg0: memref<8x8x16xbf16, #tpu.memory_space<vmem>>, %arg1: memref<16x128xbf16, #tpu.memory_space<vmem>>, %arg2: memref<128x128xbf16, #tpu.memory_space<vmem>>, %arg3: memref<128x128xbf16, #tpu.memory_space<vmem>>, %arg4: memref<1x128xf32, #tpu.memory_space<vmem>>, %arg5: memref<1x128xf32, #tpu.memory_space<vmem>>, %arg6: memref<8x128xf32, #tpu.memory_space<vmem>>) attributes {dimension_semantics = [], scalar_prefetch = 0 : i64, scratch_operands = 0 : i64, tpu.core_type = #tpu.core_type<tc>} {
    %c0 = arith.constant 0 : index
    %c0_0 = arith.constant 0 : index
    %0 = vector.load %arg1[%c0, %c0_0] : memref<16x128xbf16, #tpu.memory_space<vmem>>, vector<16x128xbf16>
    %c0_1 = arith.constant 0 : index
    %c0_2 = arith.constant 0 : index
    %1 = vector.load %arg2[%c0_1, %c0_2] : memref<128x128xbf16, #tpu.memory_space<vmem>>, vector<128x128xbf16>
    %c0_3 = arith.constant 0 : index
    %c0_4 = arith.constant 0 : index
    %2 = vector.load %arg4[%c0_3, %c0_4] : memref<1x128xf32, #tpu.memory_space<vmem>>, vector<1x128xf32>
    %3 = vector.shape_cast %2 : vector<1x128xf32> to vector<1x128xf32>
    %4 = vector.broadcast %3 : vector<1x128xf32> to vector<8x128xf32>
    %cst = arith.constant 0.000000e+00 : f32
    %5 = vector.broadcast %cst : f32 to vector<8x128xf32>
    %c0_i32 = arith.constant 0 : i32
    %6 = arith.index_cast %c0_i32 : i32 to index
    %c0_5 = arith.constant 0 : index
    %c0_6 = arith.constant 0 : index
    %7 = vector.load %arg0[%6, %c0_5, %c0_6] : memref<8x8x16xbf16, #tpu.memory_space<vmem>>, vector<1x8x16xbf16>
    %8 = vector.shape_cast %7 : vector<1x8x16xbf16> to vector<8x16xbf16>
    %cst_7 = arith.constant dense<0.000000e+00> : vector<8x128xf32>
    %9 = tpu.matmul %8, %0, %cst_7 {dimension_numbers = #tpu.dot_dimension_numbers<[1], [0], [0], [1], [0, 0, 1, 1], [], []>} : vector<8x16xbf16>, vector<16x128xbf16>, vector<8x128xf32> -> vector<8x128xf32>
    %10 = arith.addf %9, %4 : vector<8x128xf32>
    %11 = arith.truncf %5 : vector<8x128xf32> to vector<8x128xbf16>
    %cst_8 = arith.constant dense<0.000000e+00> : vector<8x128xf32>
    %12 = tpu.matmul %11, %1, %cst_8 {dimension_numbers = #tpu.dot_dimension_numbers<[1], [0], [0], [1], [0, 0, 1, 1], [], []>} : vector<8x128xbf16>, vector<128x128xbf16>, vector<8x128xf32> -> vector<8x128xf32>
    %13 = arith.addf %10, %12 : vector<8x128xf32>
    %14 = math.tanh %13 : vector<8x128xf32>
    %c1_i32 = arith.constant 1 : i32
    %15 = arith.index_cast %c1_i32 : i32 to index
    %c0_9 = arith.constant 0 : index
    %c0_10 = arith.constant 0 : index
    %16 = vector.load %arg0[%15, %c0_9, %c0_10] : memref<8x8x16xbf16, #tpu.memory_space<vmem>>, vector<1x8x16xbf16>
    %17 = vector.shape_cast %16 : vector<1x8x16xbf16> to vector<8x16xbf16>
    %cst_11 = arith.constant dense<0.000000e+00> : vector<8x128xf32>
    %18 = tpu.matmul %17, %0, %cst_11 {dimension_numbers = #tpu.dot_dimension_numbers<[1], [0], [0], [1], [0, 0, 1, 1], [], []>} : vector<8x16xbf16>, vector<16x128xbf16>, vector<8x128xf32> -> vector<8x128xf32>
    %19 = arith.addf %18, %4 : vector<8x128xf32>
    %20 = arith.truncf %14 : vector<8x128xf32> to vector<8x128xbf16>
    %cst_12 = arith.constant dense<0.000000e+00> : vector<8x128xf32>
    %21 = tpu.matmul %20, %1, %cst_12 {dimension_numbers = #tpu.dot_dimension_numbers<[1], [0], [0], [1], [0, 0, 1, 1], [], []>} : vector<8x128xbf16>, vector<128x128xbf16>, vector<8x128xf32> -> vector<8x128xf32>
    %22 = arith.addf %19, %21 : vector<8x128xf32>
    %23 = math.tanh %22 : vector<8x128xf32>
    %c2_i32 = arith.constant 2 : i32
    %24 = arith.index_cast %c2_i32 : i32 to index
    %c0_13 = arith.constant 0 : index
    %c0_14 = arith.constant 0 : index
    %25 = vector.load %arg0[%24, %c0_13, %c0_14] : memref<8x8x16xbf16, #tpu.memory_space<vmem>>, vector<1x8x16xbf16>
    %26 = vector.shape_cast %25 : vector<1x8x16xbf16> to vector<8x16xbf16>
    %cst_15 = arith.constant dense<0.000000e+00> : vector<8x128xf32>
    %27 = tpu.matmul %26, %0, %cst_15 {dimension_numbers = #tpu.dot_dimension_numbers<[1], [0], [0], [1], [0, 0, 1, 1], [], []>} : vector<8x16xbf16>, vector<16x128xbf16>, vector<8x128xf32> -> vector<8x128xf32>
    %28 = arith.addf %27, %4 : vector<8x128xf32>
    %29 = arith.truncf %23 : vector<8x128xf32> to vector<8x128xbf16>
    %cst_16 = arith.constant dense<0.000000e+00> : vector<8x128xf32>
    %30 = tpu.matmul %29, %1, %cst_16 {dimension_numbers = #tpu.dot_dimension_numbers<[1], [0], [0], [1], [0, 0, 1, 1], [], []>} : vector<8x128xbf16>, vector<128x128xbf16>, vector<8x128xf32> -> vector<8x128xf32>
    %31 = arith.addf %28, %30 : vector<8x128xf32>
    %32 = math.tanh %31 : vector<8x128xf32>
    %c3_i32 = arith.constant 3 : i32
    %33 = arith.index_cast %c3_i32 : i32 to index
    %c0_17 = arith.constant 0 : index
    %c0_18 = arith.constant 0 : index
    %34 = vector.load %arg0[%33, %c0_17, %c0_18] : memref<8x8x16xbf16, #tpu.memory_space<vmem>>, vector<1x8x16xbf16>
    %35 = vector.shape_cast %34 : vector<1x8x16xbf16> to vector<8x16xbf16>
    %cst_19 = arith.constant dense<0.000000e+00> : vector<8x128xf32>
    %36 = tpu.matmul %35, %0, %cst_19 {dimension_numbers = #tpu.dot_dimension_numbers<[1], [0], [0], [1], [0, 0, 1, 1], [], []>} : vector<8x16xbf16>, vector<16x128xbf16>, vector<8x128xf32> -> vector<8x128xf32>
    %37 = arith.addf %36, %4 : vector<8x128xf32>
    %38 = arith.truncf %32 : vector<8x128xf32> to vector<8x128xbf16>
    %cst_20 = arith.constant dense<0.000000e+00> : vector<8x128xf32>
    %39 = tpu.matmul %38, %1, %cst_20 {dimension_numbers = #tpu.dot_dimension_numbers<[1], [0], [0], [1], [0, 0, 1, 1], [], []>} : vector<8x128xbf16>, vector<128x128xbf16>, vector<8x128xf32> -> vector<8x128xf32>
    %40 = arith.addf %37, %39 : vector<8x128xf32>
    %41 = math.tanh %40 : vector<8x128xf32>
    %c4_i32 = arith.constant 4 : i32
    %42 = arith.index_cast %c4_i32 : i32 to index
    %c0_21 = arith.constant 0 : index
    %c0_22 = arith.constant 0 : index
    %43 = vector.load %arg0[%42, %c0_21, %c0_22] : memref<8x8x16xbf16, #tpu.memory_space<vmem>>, vector<1x8x16xbf16>
    %44 = vector.shape_cast %43 : vector<1x8x16xbf16> to vector<8x16xbf16>
    %cst_23 = arith.constant dense<0.000000e+00> : vector<8x128xf32>
    %45 = tpu.matmul %44, %0, %cst_23 {dimension_numbers = #tpu.dot_dimension_numbers<[1], [0], [0], [1], [0, 0, 1, 1], [], []>} : vector<8x16xbf16>, vector<16x128xbf16>, vector<8x128xf32> -> vector<8x128xf32>
    %46 = arith.addf %45, %4 : vector<8x128xf32>
    %47 = arith.truncf %41 : vector<8x128xf32> to vector<8x128xbf16>
    %cst_24 = arith.constant dense<0.000000e+00> : vector<8x128xf32>
    %48 = tpu.matmul %47, %1, %cst_24 {dimension_numbers = #tpu.dot_dimension_numbers<[1], [0], [0], [1], [0, 0, 1, 1], [], []>} : vector<8x128xbf16>, vector<128x128xbf16>, vector<8x128xf32> -> vector<8x128xf32>
    %49 = arith.addf %46, %48 : vector<8x128xf32>
    %50 = math.tanh %49 : vector<8x128xf32>
    %c5_i32 = arith.constant 5 : i32
    %51 = arith.index_cast %c5_i32 : i32 to index
    %c0_25 = arith.constant 0 : index
    %c0_26 = arith.constant 0 : index
    %52 = vector.load %arg0[%51, %c0_25, %c0_26] : memref<8x8x16xbf16, #tpu.memory_space<vmem>>, vector<1x8x16xbf16>
    %53 = vector.shape_cast %52 : vector<1x8x16xbf16> to vector<8x16xbf16>
    %cst_27 = arith.constant dense<0.000000e+00> : vector<8x128xf32>
    %54 = tpu.matmul %53, %0, %cst_27 {dimension_numbers = #tpu.dot_dimension_numbers<[1], [0], [0], [1], [0, 0, 1, 1], [], []>} : vector<8x16xbf16>, vector<16x128xbf16>, vector<8x128xf32> -> vector<8x128xf32>
    %55 = arith.addf %54, %4 : vector<8x128xf32>
    %56 = arith.truncf %50 : vector<8x128xf32> to vector<8x128xbf16>
    %cst_28 = arith.constant dense<0.000000e+00> : vector<8x128xf32>
    %57 = tpu.matmul %56, %1, %cst_28 {dimension_numbers = #tpu.dot_dimension_numbers<[1], [0], [0], [1], [0, 0, 1, 1], [], []>} : vector<8x128xbf16>, vector<128x128xbf16>, vector<8x128xf32> -> vector<8x128xf32>
    %58 = arith.addf %55, %57 : vector<8x128xf32>
    %59 = math.tanh %58 : vector<8x128xf32>
    %c6_i32 = arith.constant 6 : i32
    %60 = arith.index_cast %c6_i32 : i32 to index
    %c0_29 = arith.constant 0 : index
    %c0_30 = arith.constant 0 : index
    %61 = vector.load %arg0[%60, %c0_29, %c0_30] : memref<8x8x16xbf16, #tpu.memory_space<vmem>>, vector<1x8x16xbf16>
    %62 = vector.shape_cast %61 : vector<1x8x16xbf16> to vector<8x16xbf16>
    %cst_31 = arith.constant dense<0.000000e+00> : vector<8x128xf32>
    %63 = tpu.matmul %62, %0, %cst_31 {dimension_numbers = #tpu.dot_dimension_numbers<[1], [0], [0], [1], [0, 0, 1, 1], [], []>} : vector<8x16xbf16>, vector<16x128xbf16>, vector<8x128xf32> -> vector<8x128xf32>
    %64 = arith.addf %63, %4 : vector<8x128xf32>
    %65 = arith.truncf %59 : vector<8x128xf32> to vector<8x128xbf16>
    %cst_32 = arith.constant dense<0.000000e+00> : vector<8x128xf32>
    %66 = tpu.matmul %65, %1, %cst_32 {dimension_numbers = #tpu.dot_dimension_numbers<[1], [0], [0], [1], [0, 0, 1, 1], [], []>} : vector<8x128xbf16>, vector<128x128xbf16>, vector<8x128xf32> -> vector<8x128xf32>
    %67 = arith.addf %64, %66 : vector<8x128xf32>
    %68 = math.tanh %67 : vector<8x128xf32>
    %c7_i32 = arith.constant 7 : i32
    %69 = arith.index_cast %c7_i32 : i32 to index
    %c0_33 = arith.constant 0 : index
    %c0_34 = arith.constant 0 : index
    %70 = vector.load %arg0[%69, %c0_33, %c0_34] : memref<8x8x16xbf16, #tpu.memory_space<vmem>>, vector<1x8x16xbf16>
    %71 = vector.shape_cast %70 : vector<1x8x16xbf16> to vector<8x16xbf16>
    %cst_35 = arith.constant dense<0.000000e+00> : vector<8x128xf32>
    %72 = tpu.matmul %71, %0, %cst_35 {dimension_numbers = #tpu.dot_dimension_numbers<[1], [0], [0], [1], [0, 0, 1, 1], [], []>} : vector<8x16xbf16>, vector<16x128xbf16>, vector<8x128xf32> -> vector<8x128xf32>
    %73 = arith.addf %72, %4 : vector<8x128xf32>
    %74 = arith.truncf %68 : vector<8x128xf32> to vector<8x128xbf16>
    %cst_36 = arith.constant dense<0.000000e+00> : vector<8x128xf32>
    %75 = tpu.matmul %74, %1, %cst_36 {dimension_numbers = #tpu.dot_dimension_numbers<[1], [0], [0], [1], [0, 0, 1, 1], [], []>} : vector<8x128xbf16>, vector<128x128xbf16>, vector<8x128xf32> -> vector<8x128xf32>
    %76 = arith.addf %73, %75 : vector<8x128xf32>
    %77 = math.tanh %76 : vector<8x128xf32>
    %c8_i32 = arith.constant 8 : i32
    %78 = arith.truncf %77 : vector<8x128xf32> to vector<8x128xbf16>
    %c0_37 = arith.constant 0 : index
    %c0_38 = arith.constant 0 : index
    %79 = vector.load %arg3[%c0_37, %c0_38] : memref<128x128xbf16, #tpu.memory_space<vmem>>, vector<128x128xbf16>
    %cst_39 = arith.constant dense<0.000000e+00> : vector<8x128xf32>
    %80 = tpu.matmul %78, %79, %cst_39 {dimension_numbers = #tpu.dot_dimension_numbers<[1], [0], [0], [1], [0, 0, 1, 1], [], []>} : vector<8x128xbf16>, vector<128x128xbf16>, vector<8x128xf32> -> vector<8x128xf32>
    %c0_40 = arith.constant 0 : index
    %c0_41 = arith.constant 0 : index
    %81 = vector.load %arg5[%c0_40, %c0_41] : memref<1x128xf32, #tpu.memory_space<vmem>>, vector<1x128xf32>
    %82 = vector.broadcast %81 : vector<1x128xf32> to vector<8x128xf32>
    %83 = arith.addf %80, %82 : vector<8x128xf32>
    %c0_42 = arith.constant 0 : index
    %c0_43 = arith.constant 0 : index
    %84 = vector.load %arg6[%c0_42, %c0_43] : memref<8x128xf32, #tpu.memory_space<vmem>>, vector<8x128xf32>
    tpu.vector_store %arg6[%c0_42, %c0_43], %83 {strides = array<i32>} : memref<8x128xf32, #tpu.memory_space<vmem>>, vector<8x128xf32>,
    return
  }
}

</mosaic_0001>

<bundles_post_ra>
// kernel: encoder_forward.1
= control target key start
LH: loop header
LB: loop body
LE: loop exit
PB: predicated region body
PF: predicated region fallthrough
CT: control target
= control target key end

     0   :  { %v1352_v0 = vmov 0.0   ;;  %vm1353_vm0 = vmmov 0   ;;  %vm56_vm1 = vcmask 130048   ;;  %v1354_v12 = vmov 0   ;;  %s1696_s1 = inlined_call_operand.vmem [shape: bf16[16,128], index: 1, kind: input, shape index: {}]   ;;  %s1697_s0 = inlined_call_operand.vmem [shape: bf16[8,8,16], index: 0, kind: input, shape index: {}]   ;;  %s1698_s2 = inlined_call_operand.vmem [shape: bf16[128,128], index: 2, kind: input, shape index: {}]   ;;  %s1699_s4 = inlined_call_operand.vmem [shape: f32[1,128], index: 4, kind: input, shape index: {}]   ;;  %s1700_s3 = inlined_call_operand.vmem [shape: bf16[128,128], index: 3, kind: input, shape index: {}]   ;;  %s1701_s5 = inlined_call_operand.vmem [shape: f32[1,128], index: 5, kind: input, shape index: {}]   ;;  %s1702_s6 = inlined_call_operand.vmem [shape: f32[8,128], index: 6, kind: output, shape index: {}]  }
   0x1   :  { %1054 = vmatprep.subr.bf16.mxu0 %v1352_v0  ;;  %v1394_v1 = vld [vmem:[%s1696_s1] sm:$0xff]   ;;  %1056 = vmatprep.mubr.msk.bf16.mxu0 %vm1353_vm0, %v1352_v0  ;;  %v1418_v4 = vld [vmem:[%s1698_s2 + $0x8] sm:$0xff]   ;;  %v1430_v6 = vld [vmem:[%s1698_s2 + $0x10] sm:$0xff]  }
   0x2   :  { %v49_v2 = vld [vmem:[%s1697_s0] sm:$0xf]  ;;  %1080 = vmatprep.subr.bf16.mxu1 %v1352_v0  ;;  %1082 = vmatprep.mubr.msk.bf16.mxu1 %vm1353_vm0, %v1352_v0  ;;  %v934_v5 = vld [vmem:[%s1697_s0 + $0x4] sm:$0xf]  ;;  %v1442_v7 = vld [vmem:[%s1698_s2 + $0x18] sm:$0xff]  }
   0x3   :  { %1055 = vmatpush3.bf16.msra.mxu0 %v1394_v1  ;;  %v1408_v3 = vld [vmem:[%s1698_s2] sm:$0xff]   ;;  %1081 = vmatpush3.bf16.msra.mxu1 %v1394_v1  ;;  %v1460_v9 = vld [vmem:[%s1698_s2 + $0x28] sm:$0xff]   ;;  %v1469_v10 = vld [vmem:[%s1698_s2 + $0x30] sm:$0xff]  }
   0x4   :  { %1060 = vmatprep.subr.bf16.mxu0 %v1352_v0  ;;  %1086 = vmatprep.subr.bf16.mxu1 %v1352_v0  ;;  %v1451_v8 = vld [vmem:[%s1698_s2 + $0x20] sm:$0xff]   ;;  %v1478_v11 = vld [vmem:[%s1698_s2 + $0x38] sm:$0xff]   ;;  %v936_v21 = vld [vmem:[%s1697_s0 + $0x8] sm:$0xf] }
   0x5   :  { %v1510_v13 = vld [vmem:[%s1699_s4] ss:$0 sm:$0xff]  ;;  %v938_v22 = vld [vmem:[%s1697_s0 + $0xc] sm:$0xf]  ;;  %v940_v42 = vld [vmem:[%s1697_s0 + $0x10] sm:$0xf] }
   0x6   :  { %1057 = vmatmul.mubr.msk.bf16.vlgmr.msra.gmra.mrb[0].mxu0 %vm56_vm1, %v49_v2  ;;  %1083 = vmatmul.mubr.msk.bf16.vlgmr.msra.gmra.mrb[0].mxu1 %vm56_vm1, %v934_v5  ;;  %v942_v43 = vld [vmem:[%s1697_s0 + $0x14] sm:$0xf]  ;;  %v944_v55 = vld [vmem:[%s1697_s0 + $0x18] sm:$0xf]  ;;  %v946_v2 = vld [vmem:[%s1697_s0 + $0x1c] sm:$0xf] }
   0x7   :  { %1061 = vmatpush3.bf16.msra.mxu0 %v1408_v3  ;;  %1076 = vmatprep.mubr.msk.bf16.mxu0 %vm1353_vm0, %v1352_v0 }
   0x8   :  { %1062 = vmatprep.subr.bf16.mxu0 %v1352_v0  ;;  %1087 = vmatpush3.bf16.msra.mxu1 %v1408_v3 }
   0x9   :  { %1088 = vmatprep.subr.bf16.mxu1 %v1352_v0  ;;  %1102 = vmatprep.mubr.msk.bf16.mxu1 %vm1353_vm0, %v1352_v0 }
   0xb   :  { %1063 = vmatpush3.bf16.msra.mxu0 %v1418_v4 }
   0xc   :  { %1064 = vmatprep.subr.bf16.mxu0 %v1352_v0  ;;  %1089 = vmatpush3.bf16.msra.mxu1 %v1418_v4 }
   0xd   :  { %1090 = vmatprep.subr.bf16.mxu1 %v1352_v0 }
   0xf   :  { %1065 = vmatpush3.bf16.msra.mxu0 %v1430_v6 }
  0x10   :  { %1066 = vmatprep.subr.bf16.mxu0 %v1352_v0  ;;  %1091 = vmatpush3.bf16.msra.mxu1 %v1430_v6 }
  0x11   :  { %1092 = vmatprep.subr.bf16.mxu1 %v1352_v0 }
  0x13   :  { %1067 = vmatpush3.bf16.msra.mxu0 %v1442_v7 }
  0x14   :  { %1068 = vmatprep.subr.bf16.mxu0 %v1352_v0  ;;  %1093 = vmatpush3.bf16.msra.mxu1 %v1442_v7 }
  0x15   :  { %1094 = vmatprep.subr.bf16.mxu1 %v1352_v0 }
  0x17   :  { %1069 = vmatpush3.bf16.msra.mxu0 %v1451_v8 }
  0x18   :  { %1070 = vmatprep.subr.bf16.mxu0 %v1352_v0  ;;  %1095 = vmatpush3.bf16.msra.mxu1 %v1451_v8 }
  0x19   :  { %1096 = vmatprep.subr.bf16.mxu1 %v1352_v0 }
  0x1b   :  { %1071 = vmatpush3.bf16.msra.mxu0 %v1460_v9 }
  0x1c   :  { %1072 = vmatprep.subr.bf16.mxu0 %v1352_v0  ;;  %1097 = vmatpush3.bf16.msra.mxu1 %v1460_v9 }
  0x1d   :  { %1098 = vmatprep.subr.bf16.mxu1 %v1352_v0 }
  0x1f   :  { %1073 = vmatpush3.bf16.msra.mxu0 %v1469_v10 }
  0x20   :  { %1074 = vmatprep.subr.bf16.mxu0 %v1352_v0  ;;  %1099 = vmatpush3.bf16.msra.mxu1 %v1469_v10 }
  0x21   :  { %1100 = vmatprep.subr.bf16.mxu1 %v1352_v0 }
  0x23   :  { %1075 = vmatpush3.bf16.msra.mxu0 %v1478_v11 }
  0x24   :  { %1112 = vmatprep.subr.bf16.mxu0 %v1352_v0  ;;  %1101 = vmatpush3.bf16.msra.mxu1 %v1478_v11 }
  0x25   :  { %1106 = vmatprep.subr.bf16.mxu1 %v1352_v0 }
  0x26   :  { %1077 = vmatmul.mubr.bf16.vlgmr.msra.gmra.mrb[0].mxu0 %v1354_v12  ;;  %v1331_v12 = vld [vmem:[%s1700_s3 + $0x18] sm:$0xff]  }
  0x27   :  { %1113 = vmatpush3.bf16.msra.mxu0 %v1408_v3  ;;  %1128 = vmatprep.mubr.msk.bf16.mxu0 %vm1353_vm0, %v1352_v0 }
  0x28   :  { %1114 = vmatprep.subr.bf16.mxu0 %v1352_v0 }
  0x2b   :  { %1115 = vmatpush3.bf16.msra.mxu0 %v1418_v4 }
  0x2c   :  { %1116 = vmatprep.subr.bf16.mxu0 %v1352_v0 }
  0x2f   :  { %1117 = vmatpush3.bf16.msra.mxu0 %v1430_v6 }
  0x30   :  { %1118 = vmatprep.subr.bf16.mxu0 %v1352_v0 }
  0x33   :  { %1119 = vmatpush3.bf16.msra.mxu0 %v1442_v7 }
  0x34   :  { %1120 = vmatprep.subr.bf16.mxu0 %v1352_v0 }
  0x37   :  { %1121 = vmatpush3.bf16.msra.mxu0 %v1451_v8 }
  0x38   :  { %1122 = vmatprep.subr.bf16.mxu0 %v1352_v0 }
  0x3b   :  { %1123 = vmatpush3.bf16.msra.mxu0 %v1460_v9 }
  0x3c   :  { %1124 = vmatprep.subr.bf16.mxu0 %v1352_v0 }
  0x3f   :  { %1125 = vmatpush3.bf16.msra.mxu0 %v1469_v10 }
  0x40   :  { %1126 = vmatprep.subr.bf16.mxu0 %v1352_v0 }
  0x43   :  { %1127 = vmatpush3.bf16.msra.mxu0 %v1478_v11 }
  0x44   :  { %1164 = vmatprep.subr.bf16.mxu0 %v1352_v0 }
  0xf9   :  { %v182_v14 = vpop.f32.mrb[0].mxu0 }
  0xfa   :  { %v1282_v15 = vadd.f32 %v1510_v13, %v182_v14  ;;  %v1078_v16 = vpop.f32.mrb[1].mxu0 }
  0xfb   :  { %v185_v17 = vpop.f32.mrb[2].mxu0 }
  0xfc   :  { %1336 = vtanh.f32 %v1282_v15  ;;  %v1079_v18 = vpop.f32.mrb[3].mxu0 }
 0x106   :  { %v1337_v19 = vpop.eup %1336 }
 0x107   :  { %v235_v20 = vpack.c.bf16 %v1337_v19, %v1337_v19 }
 0x109   :  { %1103 = vmatmul.mubr.bf16.vlgmr.msra.gmra.mrb[0].mxu1 %v235_v20 }
 0x10a   :  { %1107 = vmatpush3.bf16.msra.mxu1 %v1394_v1  ;;  %1108 = vmatprep.mubr.msk.bf16.mxu1 %vm1353_vm0, %v1352_v0 }
 0x10b   :  { %1132 = vmatprep.subr.bf16.mxu1 %v1352_v0 }
 0x111   :  { %1109 = vmatmul.mubr.msk.bf16.vlgmr.msra.gmra.mrb[4].mxu1 %vm56_vm1, %v936_v21  ;;  %v1332_v21 = vld [vmem:[%s1700_s3 + $0x20] sm:$0xff]  }
 0x112   :  { %1133 = vmatpush3.bf16.msra.mxu1 %v1394_v1  ;;  %1134 = vmatprep.mubr.msk.bf16.mxu1 %vm1353_vm0, %v1352_v0 }
 0x113   :  { %1138 = vmatprep.subr.bf16.mxu1 %v1352_v0 }
 0x119   :  { %1135 = vmatmul.mubr.msk.bf16.vlgmr.msra.gmra.mrb[8].mxu1 %vm56_vm1, %v938_v22  ;;  %v1333_v22 = vld [vmem:[%s1700_s3 + $0x28] sm:$0xff]  }
 0x11a   :  { %1139 = vmatpush3.bf16.msra.mxu1 %v1408_v3  ;;  %1154 = vmatprep.mubr.msk.bf16.mxu1 %vm1353_vm0, %v1352_v0 }
 0x11b   :  { %1140 = vmatprep.subr.bf16.mxu1 %v1352_v0 }
 0x11e   :  { %1141 = vmatpush3.bf16.msra.mxu1 %v1418_v4 }
 0x11f   :  { %1142 = vmatprep.subr.bf16.mxu1 %v1352_v0 }
 0x122   :  { %1143 = vmatpush3.bf16.msra.mxu1 %v1430_v6 }
 0x123   :  { %1144 = vmatprep.subr.bf16.mxu1 %v1352_v0 }
 0x126   :  { %1145 = vmatpush3.bf16.msra.mxu1 %v1442_v7 }
 0x127   :  { %1146 = vmatprep.subr.bf16.mxu1 %v1352_v0 }
 0x12a   :  { %1147 = vmatpush3.bf16.msra.mxu1 %v1451_v8 }
 0x12b   :  { %1148 = vmatprep.subr.bf16.mxu1 %v1352_v0 }
 0x12e   :  { %1149 = vmatpush3.bf16.msra.mxu1 %v1460_v9 }
 0x12f   :  { %1150 = vmatprep.subr.bf16.mxu1 %v1352_v0 }
 0x132   :  { %1151 = vmatpush3.bf16.msra.mxu1 %v1469_v10 }
 0x133   :  { %1152 = vmatprep.subr.bf16.mxu1 %v1352_v0 }
 0x136   :  { %1153 = vmatpush3.bf16.msra.mxu1 %v1478_v11 }
 0x137   :  { %1158 = vmatprep.subr.bf16.mxu1 %v1352_v0 }
 0x1dc   :  { %v270_v23 = vpop.f32.mrb[0].mxu1 }
 0x1dd   :  { %v1283_v24 = vadd.f32 %v1510_v13, %v270_v23  ;;  %v1104_v25 = vpop.f32.mrb[1].mxu1  ;;  %v1334_v23 = vld [vmem:[%s1700_s3 + $0x30] sm:$0xff]  }
 0x1de   :  { %v273_v26 = vpop.f32.mrb[2].mxu1 }
 0x1df   :  { %1338 = vtanh.f32 %v1283_v24  ;;  %v1105_v27 = vpop.f32.mrb[3].mxu1  ;;  %v1335_v24 = vld [vmem:[%s1700_s3 + $0x38] sm:$0xff]  }
 0x1e4   :  { %v317_v30 = vpop.f32.mrb[4].mxu1 }
 0x1e5   :  { %v1110_v31 = vpop.f32.mrb[5].mxu1  ;;  %v318_v34 = vadd.f32 %v1510_v13, %v317_v30 }
 0x1e6   :  { %v320_v32 = vpop.f32.mrb[6].mxu1 }
 0x1e7   :  { %v1111_v33 = vpop.f32.mrb[7].mxu1  ;;  %v948_v32 = vld [vmem:[%s1701_s5] ss:$0 sm:$0xff] }
 0x1e9   :  { %v1339_v28 = vpop.eup %1338 }
 0x1ea   :  { %v323_v29 = vpack.c.bf16 %v1339_v28, %v1339_v28 }
 0x1ec   :  { %1129 = vmatmul.mubr.bf16.vlgmr.msra.gmra.mrb[4].mxu0 %v323_v29 }
 0x1ed   :  { %1165 = vmatpush3.bf16.msra.mxu0 %v1408_v3  ;;  %1180 = vmatprep.mubr.msk.bf16.mxu0 %vm1353_vm0, %v1352_v0 }
 0x1ee   :  { %1166 = vmatprep.subr.bf16.mxu0 %v1352_v0 }
 0x1f1   :  { %1167 = vmatpush3.bf16.msra.mxu0 %v1418_v4 }
 0x1f2   :  { %1168 = vmatprep.subr.bf16.mxu0 %v1352_v0 }
 0x1f5   :  { %1169 = vmatpush3.bf16.msra.mxu0 %v1430_v6 }
 0x1f6   :  { %1170 = vmatprep.subr.bf16.mxu0 %v1352_v0 }
 0x1f9   :  { %1171 = vmatpush3.bf16.msra.mxu0 %v1442_v7 }
 0x1fa   :  { %1172 = vmatprep.subr.bf16.mxu0 %v1352_v0 }
 0x1fd   :  { %1173 = vmatpush3.bf16.msra.mxu0 %v1451_v8 }
 0x1fe   :  { %1174 = vmatprep.subr.bf16.mxu0 %v1352_v0 }
 0x201   :  { %1175 = vmatpush3.bf16.msra.mxu0 %v1460_v9 }
 0x202   :  { %1176 = vmatprep.subr.bf16.mxu0 %v1352_v0 }
 0x205   :  { %1177 = vmatpush3.bf16.msra.mxu0 %v1469_v10 }
 0x206   :  { %1178 = vmatprep.subr.bf16.mxu0 %v1352_v0 }
 0x209   :  { %1179 = vmatpush3.bf16.msra.mxu0 %v1478_v11 }
 0x20a   :  { %1210 = vmatprep.subr.bf16.mxu0 %v1352_v0 }
 0x2bf   :  { %v358_v35 = vpop.f32.mrb[4].mxu0 }
 0x2c0   :  { %v364_v36 = vadd.f32 %v358_v35, %v318_v34  ;;  %v1130_v37 = vpop.f32.mrb[5].mxu0 }
 0x2c1   :  { %v361_v38 = vpop.f32.mrb[6].mxu0 }
 0x2c2   :  { %1340 = vtanh.f32 %v364_v36  ;;  %v1131_v39 = vpop.f32.mrb[7].mxu0 }
 0x2cc   :  { %v1341_v40 = vpop.eup %1340 }
 0x2cd   :  { %v411_v41 = vpack.c.bf16 %v1341_v40, %v1341_v40 }
 0x2cf   :  { %1155 = vmatmul.mubr.bf16.vlgmr.msra.gmra.mrb[8].mxu1 %v411_v41 }
 0x2d0   :  { %1159 = vmatpush3.bf16.msra.mxu1 %v1394_v1  ;;  %1160 = vmatprep.mubr.msk.bf16.mxu1 %vm1353_vm0, %v1352_v0 }
 0x2d1   :  { %1184 = vmatprep.subr.bf16.mxu1 %v1352_v0 }
 0x2d7   :  { %1161 = vmatmul.mubr.msk.bf16.vlgmr.msra.gmra.mrb[12].mxu1 %vm56_vm1, %v940_v42 }
 0x2d8   :  { %1185 = vmatpush3.bf16.msra.mxu1 %v1394_v1  ;;  %1186 = vmatprep.mubr.msk.bf16.mxu1 %vm1353_vm0, %v1352_v0 }
 0x2d9   :  { %1190 = vmatprep.subr.bf16.mxu1 %v1352_v0 }
 0x2df   :  { %1187 = vmatmul.mubr.msk.bf16.vlgmr.msra.gmra.mrb[16].mxu1 %vm56_vm1, %v942_v43 }
 0x2e0   :  { %1191 = vmatpush3.bf16.msra.mxu1 %v1408_v3  ;;  %1206 = vmatprep.mubr.msk.bf16.mxu1 %vm1353_vm0, %v1352_v0 }
 0x2e1   :  { %1192 = vmatprep.subr.bf16.mxu1 %v1352_v0 }
 0x2e4   :  { %1193 = vmatpush3.bf16.msra.mxu1 %v1418_v4 }
 0x2e5   :  { %1194 = vmatprep.subr.bf16.mxu1 %v1352_v0 }
 0x2e8   :  { %1195 = vmatpush3.bf16.msra.mxu1 %v1430_v6 }
 0x2e9   :  { %1196 = vmatprep.subr.bf16.mxu1 %v1352_v0 }
 0x2ec   :  { %1197 = vmatpush3.bf16.msra.mxu1 %v1442_v7 }
 0x2ed   :  { %1198 = vmatprep.subr.bf16.mxu1 %v1352_v0 }
 0x2f0   :  { %1199 = vmatpush3.bf16.msra.mxu1 %v1451_v8 }
 0x2f1   :  { %1200 = vmatprep.subr.bf16.mxu1 %v1352_v0 }
 0x2f4   :  { %1201 = vmatpush3.bf16.msra.mxu1 %v1460_v9 }
 0x2f5   :  { %1202 = vmatprep.subr.bf16.mxu1 %v1352_v0 }
 0x2f8   :  { %1203 = vmatpush3.bf16.msra.mxu1 %v1469_v10 }
 0x2f9   :  { %1204 = vmatprep.subr.bf16.mxu1 %v1352_v0 }
 0x2fc   :  { %1205 = vmatpush3.bf16.msra.mxu1 %v1478_v11 }
 0x2fd   :  { %1236 = vmatprep.subr.bf16.mxu1 %v1352_v0 }
 0x3a2   :  { %v446_v44 = vpop.f32.mrb[8].mxu1 }
 0x3a3   :  { %v1286_v45 = vadd.f32 %v1510_v13, %v446_v44  ;;  %v1156_v46 = vpop.f32.mrb[9].mxu1 }
 0x3a4   :  { %v449_v47 = vpop.f32.mrb[10].mxu1 }
 0x3a5   :  { %1342 = vtanh.f32 %v1286_v45  ;;  %v1157_v48 = vpop.f32.mrb[11].mxu1 }
 0x3aa   :  { %v493_v51 = vpop.f32.mrb[12].mxu1 }
 0x3ab   :  { %v1162_v52 = vpop.f32.mrb[13].mxu1  ;;  %v494_v56 = vadd.f32 %v1510_v13, %v493_v51 }
 0x3ac   :  { %v496_v53 = vpop.f32.mrb[14].mxu1 }
 0x3ad   :  { %v1163_v54 = vpop.f32.mrb[15].mxu1 }
 0x3af   :  { %v1343_v49 = vpop.eup %1342 }
 0x3b0   :  { %v499_v50 = vpack.c.bf16 %v1343_v49, %v1343_v49 }
 0x3b2   :  { %1181 = vmatmul.mubr.bf16.vlgmr.msra.gmra.mrb[8].mxu0 %v499_v50 }
 0x3b3   :  { %1211 = vmatpush3.bf16.msra.mxu0 %v1394_v1  ;;  %1212 = vmatprep.mubr.msk.bf16.mxu0 %vm1353_vm0, %v1352_v0 }
 0x3b4   :  { %1216 = vmatprep.subr.bf16.mxu0 %v1352_v0 }
 0x3ba   :  { %1213 = vmatmul.mubr.msk.bf16.vlgmr.msra.gmra.mrb[12].mxu0 %vm56_vm1, %v944_v55 }
 0x3bb   :  { %1217 = vmatpush3.bf16.msra.mxu0 %v1408_v3  ;;  %1232 = vmatprep.mubr.msk.bf16.mxu0 %vm1353_vm0, %v1352_v0 }
 0x3bc   :  { %1218 = vmatprep.subr.bf16.mxu0 %v1352_v0 }
 0x3bf   :  { %1219 = vmatpush3.bf16.msra.mxu0 %v1418_v4 }
 0x3c0   :  { %1220 = vmatprep.subr.bf16.mxu0 %v1352_v0 }
 0x3c3   :  { %1221 = vmatpush3.bf16.msra.mxu0 %v1430_v6 }
 0x3c4   :  { %1222 = vmatprep.subr.bf16.mxu0 %v1352_v0 }
 0x3c7   :  { %1223 = vmatpush3.bf16.msra.mxu0 %v1442_v7 }
 0x3c8   :  { %1224 = vmatprep.subr.bf16.mxu0 %v1352_v0 }
 0x3cb   :  { %1225 = vmatpush3.bf16.msra.mxu0 %v1451_v8 }
 0x3cc   :  { %1226 = vmatprep.subr.bf16.mxu0 %v1352_v0 }
 0x3cf   :  { %1227 = vmatpush3.bf16.msra.mxu0 %v1460_v9 }
 0x3d0   :  { %1228 = vmatprep.subr.bf16.mxu0 %v1352_v0 }
 0x3d3   :  { %1229 = vmatpush3.bf16.msra.mxu0 %v1469_v10 }
 0x3d4   :  { %1230 = vmatprep.subr.bf16.mxu0 %v1352_v0 }
 0x3d7   :  { %1231 = vmatpush3.bf16.msra.mxu0 %v1478_v11 }
 0x3d8   :  { %1262 = vmatprep.subr.bf16.mxu0 %v1352_v0 }
 0x485   :  { %v534_v57 = vpop.f32.mrb[8].mxu0 }
 0x486   :  { %v540_v58 = vadd.f32 %v534_v57, %v494_v56  ;;  %v1182_v59 = vpop.f32.mrb[9].mxu0 }
 0x487   :  { %v537_v60 = vpop.f32.mrb[10].mxu0 }
 0x488   :  { %1344 = vtanh.f32 %v540_v58  ;;  %v1183_v61 = vpop.f32.mrb[11].mxu0 }
 0x492   :  { %v1345_v62 = vpop.eup %1344 }
 0x493   :  { %v587_v63 = vpack.c.bf16 %v1345_v62, %v1345_v62 }
 0x495   :  { %1207 = vmatmul.mubr.bf16.vlgmr.msra.gmra.mrb[16].mxu1 %v587_v63 }
 0x496   :  { %1237 = vmatpush3.bf16.msra.mxu1 %v1394_v1  ;;  %1238 = vmatprep.mubr.msk.bf16.mxu1 %vm1353_vm0, %v1352_v0 }
 0x497   :  { %1242 = vmatprep.subr.bf16.mxu1 %v1352_v0 }
 0x49d   :  { %1239 = vmatmul.mubr.msk.bf16.vlgmr.msra.gmra.mrb[20].mxu1 %vm56_vm1, %v946_v2 }
 0x49e   :  { %1243 = vmatpush3.bf16.msra.mxu1 %v1408_v3  ;;  %1258 = vmatprep.mubr.msk.bf16.mxu1 %vm1353_vm0, %v1352_v0 }
 0x49f   :  { %1244 = vmatprep.subr.bf16.mxu1 %v1352_v0 }
 0x4a2   :  { %1245 = vmatpush3.bf16.msra.mxu1 %v1418_v4 }
 0x4a3   :  { %1246 = vmatprep.subr.bf16.mxu1 %v1352_v0 }
 0x4a6   :  { %1247 = vmatpush3.bf16.msra.mxu1 %v1430_v6 }
 0x4a7   :  { %1248 = vmatprep.subr.bf16.mxu1 %v1352_v0 }
 0x4aa   :  { %1249 = vmatpush3.bf16.msra.mxu1 %v1442_v7 }
 0x4ab   :  { %1250 = vmatprep.subr.bf16.mxu1 %v1352_v0 }
 0x4ae   :  { %1251 = vmatpush3.bf16.msra.mxu1 %v1451_v8 }
 0x4af   :  { %1252 = vmatprep.subr.bf16.mxu1 %v1352_v0 }
 0x4b2   :  { %1253 = vmatpush3.bf16.msra.mxu1 %v1460_v9  ;;  %v1328_v9 = vld [vmem:[%s1700_s3] sm:$0xff]  }
 0x4b3   :  { %1254 = vmatprep.subr.bf16.mxu1 %v1352_v0 }
 0x4b6   :  { %1255 = vmatpush3.bf16.msra.mxu1 %v1469_v10  ;;  %v1329_v10 = vld [vmem:[%s1700_s3 + $0x8] sm:$0xff]  }
 0x4b7   :  { %1256 = vmatprep.subr.bf16.mxu1 %v1352_v0 }
 0x4ba   :  { %1257 = vmatpush3.bf16.msra.mxu1 %v1478_v11  ;;  %v1330_v11 = vld [vmem:[%s1700_s3 + $0x10] sm:$0xff]  }
 0x568   :  { %v622_v1 = vpop.f32.mrb[16].mxu1 }
 0x569   :  { %v1289_v3 = vadd.f32 %v1510_v13, %v622_v1  ;;  %v1208_v4 = vpop.f32.mrb[17].mxu1 }
 0x56a   :  { %v625_v5 = vpop.f32.mrb[18].mxu1 }
 0x56b   :  { %1346 = vtanh.f32 %v1289_v3  ;;  %v1209_v6 = vpop.f32.mrb[19].mxu1 }
 0x575   :  { %v1347_v7 = vpop.eup %1346 }
 0x576   :  { %v675_v8 = vpack.c.bf16 %v1347_v7, %v1347_v7 }
 0x578   :  { %1233 = vmatmul.mubr.bf16.vlgmr.msra.gmra.mrb[12].mxu0 %v675_v8 }
 0x579   :  { %1278 = vmatprep.mubr.msk.bf16.mxu0 %vm1353_vm0, %v1352_v0  ;;  %1263 = vmatpush3.bf16.msra.mxu0 %v1328_v9 }
 0x57a   :  { %1264 = vmatprep.subr.bf16.mxu0 %v1352_v0 }
 0x57d   :  { %1265 = vmatpush3.bf16.msra.mxu0 %v1329_v10 }
 0x57e   :  { %1266 = vmatprep.subr.bf16.mxu0 %v1352_v0 }
 0x581   :  { %1267 = vmatpush3.bf16.msra.mxu0 %v1330_v11 }
 0x582   :  { %1268 = vmatprep.subr.bf16.mxu0 %v1352_v0 }
 0x585   :  { %1269 = vmatpush3.bf16.msra.mxu0 %v1331_v12 }
 0x586   :  { %1270 = vmatprep.subr.bf16.mxu0 %v1352_v0 }
 0x589   :  { %1271 = vmatpush3.bf16.msra.mxu0 %v1332_v21 }
 0x58a   :  { %1272 = vmatprep.subr.bf16.mxu0 %v1352_v0 }
 0x58d   :  { %1273 = vmatpush3.bf16.msra.mxu0 %v1333_v22 }
 0x58e   :  { %1274 = vmatprep.subr.bf16.mxu0 %v1352_v0 }
 0x591   :  { %1275 = vmatpush3.bf16.msra.mxu0 %v1334_v23 }
 0x592   :  { %1276 = vmatprep.subr.bf16.mxu0 %v1352_v0 }
 0x595   :  { %1277 = vmatpush3.bf16.msra.mxu0 %v1335_v24 }
 0x64b   :  { %v710_v14 = vpop.f32.mrb[12].mxu0 }
 0x64c   :  { %v1290_v15 = vadd.f32 %v1510_v13, %v710_v14  ;;  %v1234_v16 = vpop.f32.mrb[13].mxu0 }
 0x64d   :  { %v713_v17 = vpop.f32.mrb[14].mxu0 }
 0x64e   :  { %1348 = vtanh.f32 %v1290_v15  ;;  %v1235_v18 = vpop.f32.mrb[15].mxu0 }
 0x658   :  { %v1349_v19 = vpop.eup %1348 }
 0x659   :  { %v763_v20 = vpack.c.bf16 %v1349_v19, %v1349_v19 }
 0x65b   :  { %1259 = vmatmul.mubr.bf16.vlgmr.msra.gmra.mrb[20].mxu1 %v763_v20 }
 0x72e   :  { %v798_v25 = vpop.f32.mrb[20].mxu1 }
 0x72f   :  { %v1291_v26 = vadd.f32 %v1510_v13, %v798_v25  ;;  %v1260_v27 = vpop.f32.mrb[21].mxu1 }
 0x730   :  { %v801_v28 = vpop.f32.mrb[22].mxu1 }
 0x731   :  { %1350 = vtanh.f32 %v1291_v26  ;;  %v1261_v29 = vpop.f32.mrb[23].mxu1 }
 0x73b   :  { %v1351_v30 = vpop.eup %1350 }
 0x73c   :  { %v806_v31 = vpack.c.bf16 %v1351_v30, %v1351_v30 }
 0x73e   :  { %1279 = vmatmul.mubr.bf16.vlgmr.msra.gmra.mrb[16].mxu0 %v806_v31 }
 0x811   :  { %v912_v0 = vpop.f32.mrb[16].mxu0 }
 0x812   :  { %v913_v33 = vadd.f32 %v948_v32, %v912_v0  ;;  %v1280_v34 = vpop.f32.mrb[17].mxu0 }
 0x813   :  { %v915_v35 = vpop.f32.mrb[18].mxu0 }
 0x814   :  { %918 = vst [vmem:[%s1702_s6] sm:$0xff] %v913_v33  ;;  %v1281_v13 = vpop.f32.mrb[19].mxu0 }

</bundles_post_ra>
